<compile_context>
chip_gen: v5e
topology: v5e:2x2
jax: 0.10.0
libtpu: 0.0.40
codegen_flags: <defaults>
</compile_context>

<pallas_src>
import jax
import jax.numpy as jnp
from jax.experimental import pallas as pl
from jax.experimental.pallas import tpu as pltpu


def _round_up(x, m):
    return (x + m - 1) // m * m


def conv2d_pallas(x_nchw, w_oihw, bias):
    """PyTorch-semantics Conv2d (stride=1, padding=0, dilation=1), NCHW in/out."""
    N, Cin, H, W = x_nchw.shape
    Cout, _, KH, KW = w_oihw.shape
    Ho, Wo = H - KH + 1, W - KW + 1
    HW = H * W
    NTAP = KH * KW * Cin                       # 27 taps
    KPAD = _round_up(NTAP + 1, 8)              # 32: taps + bias row, padded
    CPAD = _round_up(Cout, 8)                  # 8:  Cout padded to full sublanes
    # Largest lane shift still feeding a valid output position.
    VALID = HW - ((KH - 1) * W + (KW - 1))     # 222 (all valid flat indices < 222)

    def kernel(x_ref, w_ref, o_ref, p_ref):
        # x_ref: (N*Cin, H*W)     NCHW activations, spatial flattened onto lanes
        # w_ref: (CPAD, KPAD)     packed weights: taps | bias column | zero pad
        # o_ref: (N, CPAD, H*W)   full-frame conv result (frame coordinates)
        # p_ref: (KPAD, N*H*W)    scratch patch matrix ("im2col" rows), batched on lanes
        p_ref[...] = jnp.zeros_like(p_ref)                             # pad rows & tails = 0
        p_ref[NTAP:NTAP + 1, :] = jnp.ones((1, N * HW), jnp.float32)   # bias row = 1
        for n in range(N):                                             # N is tiny -> unrolled
            base = n * HW                                              # lane-aligned (256 | 128)
            for kh in range(KH):
                for kw in range(KW):
                    s = kh * W + kw                                    # static flat lane shift
                    r = (kh * KW + kw) * Cin
                    # p[r + c, n*HW + q] = x[n, c, q + s]  (kh, kw fold into one
                    # static lane offset; Mosaic emits the lane-realigning copy).
                    p_ref[r:r + Cin, base:base + VALID] = (
                        x_ref[n * Cin:(n + 1) * Cin, s:s + VALID])
        # ONE lane-dense MXU matmul for the whole batch:
        # (8,32) @ (32, N*256) -> (8, N*256); bias already folded in.
        res = jnp.dot(w_ref[...], p_ref[...], preferred_element_type=jnp.float32)
        for n in range(N):
            # Lane-aligned slice (multiples of HW=256) -> unmasked (8, 256) stores.
            o_ref[n] = res[:, n * HW:(n + 1) * HW]

    # ---- wrapper-side packing: only a free reshape on the activations ----
    x2 = x_nchw.reshape(N * Cin, HW)                                   # no transpose

    # Tiny one-time weight repack (<1 KB): (Cout,Cin,KH,KW) -> (CPAD,KPAD),
    # tap order (kh, kw, cin), bias folded in as column NTAP.
    w_taps = jnp.transpose(w_oihw, (0, 2, 3, 1)).reshape(Cout, NTAP)
    w_aug = jnp.concatenate([w_taps, bias.reshape(Cout, 1)], axis=1)
    w_pad = jnp.zeros((CPAD, KPAD), jnp.float32).at[:Cout, :NTAP + 1].set(w_aug)

    out_frames = pl.pallas_call(
        kernel,
        out_shape=jax.ShapeDtypeStruct((N, CPAD, HW), jnp.float32),
        grid=(1,),                                                     # single grid step
        in_specs=[
            pl.BlockSpec((N * Cin, HW), lambda i: (0, 0)),
            pl.BlockSpec((CPAD, KPAD), lambda i: (0, 0)),
        ],
        out_specs=pl.BlockSpec((N, CPAD, HW), lambda i: (0, 0, 0)),
        scratch_shapes=[pltpu.VMEM((KPAD, N * HW), jnp.float32)],
        compiler_params=pltpu.CompilerParams(
            dimension_semantics=("arbitrary",)),
    )(x2, w_pad)

    # Valid-window extraction: free reshape + one tiny slice, no transpose.
    return out_frames.reshape(N, CPAD, H, W)[:, :Cout, :Ho, :Wo]


if __name__ == "__main__":
    key = jax.random.PRNGKey(0)
    kx, kw, kb = jax.random.split(key, 3)

    CIN, COUT, K = 3, 6, 3
    # Small shapes consistent with the module: batch=2, Cin=3, 16x16 spatial.
    x = jax.random.normal(kx, (2, CIN, 16, 16), dtype=jnp.float32)

    # Deterministic PyTorch-style init (uniform bound 1/sqrt(fan_in)).
    fan_in = CIN * K * K
    bound = 1.0 / (fan_in ** 0.5)
    w = jax.random.uniform(kw, (COUT, CIN, K, K), jnp.float32, -bound, bound)
    b = jax.random.uniform(kb, (COUT,), jnp.float32, -bound, bound)

    out = conv2d_pallas(x, w, b)
    jax.block_until_ready(out)

    # Cross-check against XLA's conv (tolerance allows for MXU matmul precision).
    ref = jax.lax.conv_general_dilated(
        x, w, window_strides=(1, 1), padding="VALID",
        dimension_numbers=("NCHW", "OIHW", "NCHW")) + b[None, :, None, None]
    assert out.shape == (2, COUT, 14, 14)
    assert jnp.allclose(out, ref, atol=2e-2, rtol=2e-2), \
        float(jnp.max(jnp.abs(out - ref)))

    print("KERNEL_OK")
</pallas_src>

<mosaic_0001>
module attributes {stable_mosaic.version = 11 : i64} {
  func.func @kernel(%arg0: i32, %arg1: memref<6x256xf32, #tpu.memory_space<vmem>>, %arg2: memref<8x32xf32, #tpu.memory_space<vmem>>, %arg3: memref<2x8x256xf32, #tpu.memory_space<vmem>>, %arg4: memref<32x512xf32, #tpu.memory_space<vmem>>) attributes {dimension_semantics = [#tpu.dimension_semantics<arbitrary>], iteration_bounds = array<i64: 1>, scalar_prefetch = 0 : i64, scratch_operands = 1 : i64, tpu.core_type = #tpu.core_type<tc>, window_params = [{pipeline_mode = #tpu.pipeline_mode<synchronous>, transform_indices = @transform_0, window_bounds = array<i64: 6, 256>}, {pipeline_mode = #tpu.pipeline_mode<synchronous>, transform_indices = @transform_1, window_bounds = array<i64: 8, 32>}, {pipeline_mode = #tpu.pipeline_mode<synchronous>, transform_indices = @transform_2, window_bounds = array<i64: 2, 8, 256>}]} {
    %cst = arith.constant 0.000000e+00 : f32
    %0 = vector.broadcast %cst : f32 to vector<32x512xf32>
    %c0 = arith.constant 0 : index
    %c0_0 = arith.constant 0 : index
    %1 = vector.load %arg4[%c0, %c0_0] : memref<32x512xf32, #tpu.memory_space<vmem>>, vector<32x512xf32>
    tpu.vector_store %arg4[%c0, %c0_0], %0 {strides = array<i32>} : memref<32x512xf32, #tpu.memory_space<vmem>>, vector<32x512xf32>,
    %cst_1 = arith.constant 1.000000e+00 : f32
    %2 = vector.broadcast %cst_1 : f32 to vector<1x512xf32>
    %c27 = arith.constant 27 : index
    %c0_2 = arith.constant 0 : index
    %3 = vector.load %arg4[%c27, %c0_2] : memref<32x512xf32, #tpu.memory_space<vmem>>, vector<1x512xf32>
    tpu.vector_store %arg4[%c27, %c0_2], %2 {strides = array<i32>} : memref<32x512xf32, #tpu.memory_space<vmem>>, vector<1x512xf32>,
    %c0_3 = arith.constant 0 : index
    %c0_4 = arith.constant 0 : index
    %4 = vector.load %arg1[%c0_3, %c0_4] : memref<6x256xf32, #tpu.memory_space<vmem>>, vector<3x222xf32>
    %c0_5 = arith.constant 0 : index
    %c0_6 = arith.constant 0 : index
    %5 = vector.load %arg4[%c0_5, %c0_6] : memref<32x512xf32, #tpu.memory_space<vmem>>, vector<3x222xf32>
    tpu.vector_store %arg4[%c0_5, %c0_6], %4 {strides = array<i32>} : memref<32x512xf32, #tpu.memory_space<vmem>>, vector<3x222xf32>,
    %c0_7 = arith.constant 0 : index
    %c1 = arith.constant 1 : index
    %6 = vector.load %arg1[%c0_7, %c1] : memref<6x256xf32, #tpu.memory_space<vmem>>, vector<3x222xf32>
    %c3 = arith.constant 3 : index
    %c0_8 = arith.constant 0 : index
    %7 = vector.load %arg4[%c3, %c0_8] : memref<32x512xf32, #tpu.memory_space<vmem>>, vector<3x222xf32>
    tpu.vector_store %arg4[%c3, %c0_8], %6 {strides = array<i32>} : memref<32x512xf32, #tpu.memory_space<vmem>>, vector<3x222xf32>,
    %c0_9 = arith.constant 0 : index
    %c2 = arith.constant 2 : index
    %8 = vector.load %arg1[%c0_9, %c2] : memref<6x256xf32, #tpu.memory_space<vmem>>, vector<3x222xf32>
    %c6 = arith.constant 6 : index
    %c0_10 = arith.constant 0 : index
    %9 = vector.load %arg4[%c6, %c0_10] : memref<32x512xf32, #tpu.memory_space<vmem>>, vector<3x222xf32>
    tpu.vector_store %arg4[%c6, %c0_10], %8 {strides = array<i32>} : memref<32x512xf32, #tpu.memory_space<vmem>>, vector<3x222xf32>,
    %c0_11 = arith.constant 0 : index
    %c16 = arith.constant 16 : index
    %10 = vector.load %arg1[%c0_11, %c16] : memref<6x256xf32, #tpu.memory_space<vmem>>, vector<3x222xf32>
    %c9 = arith.constant 9 : index
    %c0_12 = arith.constant 0 : index
    %11 = vector.load %arg4[%c9, %c0_12] : memref<32x512xf32, #tpu.memory_space<vmem>>, vector<3x222xf32>
    tpu.vector_store %arg4[%c9, %c0_12], %10 {strides = array<i32>} : memref<32x512xf32, #tpu.memory_space<vmem>>, vector<3x222xf32>,
    %c0_13 = arith.constant 0 : index
    %c17 = arith.constant 17 : index
    %12 = vector.load %arg1[%c0_13, %c17] : memref<6x256xf32, #tpu.memory_space<vmem>>, vector<3x222xf32>
    %c12 = arith.constant 12 : index
    %c0_14 = arith.constant 0 : index
    %13 = vector.load %arg4[%c12, %c0_14] : memref<32x512xf32, #tpu.memory_space<vmem>>, vector<3x222xf32>
    tpu.vector_store %arg4[%c12, %c0_14], %12 {strides = array<i32>} : memref<32x512xf32, #tpu.memory_space<vmem>>, vector<3x222xf32>,
    %c0_15 = arith.constant 0 : index
    %c18 = arith.constant 18 : index
    %14 = vector.load %arg1[%c0_15, %c18] : memref<6x256xf32, #tpu.memory_space<vmem>>, vector<3x222xf32>
    %c15 = arith.constant 15 : index
    %c0_16 = arith.constant 0 : index
    %15 = vector.load %arg4[%c15, %c0_16] : memref<32x512xf32, #tpu.memory_space<vmem>>, vector<3x222xf32>
    tpu.vector_store %arg4[%c15, %c0_16], %14 {strides = array<i32>} : memref<32x512xf32, #tpu.memory_space<vmem>>, vector<3x222xf32>,
    %c0_17 = arith.constant 0 : index
    %c32 = arith.constant 32 : index
    %16 = vector.load %arg1[%c0_17, %c32] : memref<6x256xf32, #tpu.memory_space<vmem>>, vector<3x222xf32>
    %c18_18 = arith.constant 18 : index
    %c0_19 = arith.constant 0 : index
    %17 = vector.load %arg4[%c18_18, %c0_19] : memref<32x512xf32, #tpu.memory_space<vmem>>, vector<3x222xf32>
    tpu.vector_store %arg4[%c18_18, %c0_19], %16 {strides = array<i32>} : memref<32x512xf32, #tpu.memory_space<vmem>>, vector<3x222xf32>,
    %c0_20 = arith.constant 0 : index
    %c33 = arith.constant 33 : index
    %18 = vector.load %arg1[%c0_20, %c33] : memref<6x256xf32, #tpu.memory_space<vmem>>, vector<3x222xf32>
    %c21 = arith.constant 21 : index
    %c0_21 = arith.constant 0 : index
    %19 = vector.load %arg4[%c21, %c0_21] : memref<32x512xf32, #tpu.memory_space<vmem>>, vector<3x222xf32>
    tpu.vector_store %arg4[%c21, %c0_21], %18 {strides = array<i32>} : memref<32x512xf32, #tpu.memory_space<vmem>>, vector<3x222xf32>,
    %c0_22 = arith.constant 0 : index
    %c34 = arith.constant 34 : index
    %20 = vector.load %arg1[%c0_22, %c34] : memref<6x256xf32, #tpu.memory_space<vmem>>, vector<3x222xf32>
    %c24 = arith.constant 24 : index
    %c0_23 = arith.constant 0 : index
    %21 = vector.load %arg4[%c24, %c0_23] : memref<32x512xf32, #tpu.memory_space<vmem>>, vector<3x222xf32>
    tpu.vector_store %arg4[%c24, %c0_23], %20 {strides = array<i32>} : memref<32x512xf32, #tpu.memory_space<vmem>>, vector<3x222xf32>,
    %c3_24 = arith.constant 3 : index
    %c0_25 = arith.constant 0 : index
    %22 = vector.load %arg1[%c3_24, %c0_25] : memref<6x256xf32, #tpu.memory_space<vmem>>, vector<3x222xf32>
    %c0_26 = arith.constant 0 : index
    %c256 = arith.constant 256 : index
    %23 = vector.load %arg4[%c0_26, %c256] : memref<32x512xf32, #tpu.memory_space<vmem>>, vector<3x222xf32>
    tpu.vector_store %arg4[%c0_26, %c256], %22 {strides = array<i32>} : memref<32x512xf32, #tpu.memory_space<vmem>>, vector<3x222xf32>,
    %c3_27 = arith.constant 3 : index
    %c1_28 = arith.constant 1 : index
    %24 = vector.load %arg1[%c3_27, %c1_28] : memref<6x256xf32, #tpu.memory_space<vmem>>, vector<3x222xf32>
    %c3_29 = arith.constant 3 : index
    %c256_30 = arith.constant 256 : index
    %25 = vector.load %arg4[%c3_29, %c256_30] : memref<32x512xf32, #tpu.memory_space<vmem>>, vector<3x222xf32>
    tpu.vector_store %arg4[%c3_29, %c256_30], %24 {strides = array<i32>} : memref<32x512xf32, #tpu.memory_space<vmem>>, vector<3x222xf32>,
    %c3_31 = arith.constant 3 : index
    %c2_32 = arith.constant 2 : index
    %26 = vector.load %arg1[%c3_31, %c2_32] : memref<6x256xf32, #tpu.memory_space<vmem>>, vector<3x222xf32>
    %c6_33 = arith.constant 6 : index
    %c256_34 = arith.constant 256 : index
    %27 = vector.load %arg4[%c6_33, %c256_34] : memref<32x512xf32, #tpu.memory_space<vmem>>, vector<3x222xf32>
    tpu.vector_store %arg4[%c6_33, %c256_34], %26 {strides = array<i32>} : memref<32x512xf32, #tpu.memory_space<vmem>>, vector<3x222xf32>,
    %c3_35 = arith.constant 3 : index
    %c16_36 = arith.constant 16 : index
    %28 = vector.load %arg1[%c3_35, %c16_36] : memref<6x256xf32, #tpu.memory_space<vmem>>, vector<3x222xf32>
    %c9_37 = arith.constant 9 : index
    %c256_38 = arith.constant 256 : index
    %29 = vector.load %arg4[%c9_37, %c256_38] : memref<32x512xf32, #tpu.memory_space<vmem>>, vector<3x222xf32>
    tpu.vector_store %arg4[%c9_37, %c256_38], %28 {strides = array<i32>} : memref<32x512xf32, #tpu.memory_space<vmem>>, vector<3x222xf32>,
    %c3_39 = arith.constant 3 : index
    %c17_40 = arith.constant 17 : index
    %30 = vector.load %arg1[%c3_39, %c17_40] : memref<6x256xf32, #tpu.memory_space<vmem>>, vector<3x222xf32>
    %c12_41 = arith.constant 12 : index
    %c256_42 = arith.constant 256 : index
    %31 = vector.load %arg4[%c12_41, %c256_42] : memref<32x512xf32, #tpu.memory_space<vmem>>, vector<3x222xf32>
    tpu.vector_store %arg4[%c12_41, %c256_42], %30 {strides = array<i32>} : memref<32x512xf32, #tpu.memory_space<vmem>>, vector<3x222xf32>,
    %c3_43 = arith.constant 3 : index
    %c18_44 = arith.constant 18 : index
    %32 = vector.load %arg1[%c3_43, %c18_44] : memref<6x256xf32, #tpu.memory_space<vmem>>, vector<3x222xf32>
    %c15_45 = arith.constant 15 : index
    %c256_46 = arith.constant 256 : index
    %33 = vector.load %arg4[%c15_45, %c256_46] : memref<32x512xf32, #tpu.memory_space<vmem>>, vector<3x222xf32>
    tpu.vector_store %arg4[%c15_45, %c256_46], %32 {strides = array<i32>} : memref<32x512xf32, #tpu.memory_space<vmem>>, vector<3x222xf32>,
    %c3_47 = arith.constant 3 : index
    %c32_48 = arith.constant 32 : index
    %34 = vector.load %arg1[%c3_47, %c32_48] : memref<6x256xf32, #tpu.memory_space<vmem>>, vector<3x222xf32>
    %c18_49 = arith.constant 18 : index
    %c256_50 = arith.constant 256 : index
    %35 = vector.load %arg4[%c18_49, %c256_50] : memref<32x512xf32, #tpu.memory_space<vmem>>, vector<3x222xf32>
    tpu.vector_store %arg4[%c18_49, %c256_50], %34 {strides = array<i32>} : memref<32x512xf32, #tpu.memory_space<vmem>>, vector<3x222xf32>,
    %c3_51 = arith.constant 3 : index
    %c33_52 = arith.constant 33 : index
    %36 = vector.load %arg1[%c3_51, %c33_52] : memref<6x256xf32, #tpu.memory_space<vmem>>, vector<3x222xf32>
    %c21_53 = arith.constant 21 : index
    %c256_54 = arith.constant 256 : index
    %37 = vector.load %arg4[%c21_53, %c256_54] : memref<32x512xf32, #tpu.memory_space<vmem>>, vector<3x222xf32>
    tpu.vector_store %arg4[%c21_53, %c256_54], %36 {strides = array<i32>} : memref<32x512xf32, #tpu.memory_space<vmem>>, vector<3x222xf32>,
    %c3_55 = arith.constant 3 : index
    %c34_56 = arith.constant 34 : index
    %38 = vector.load %arg1[%c3_55, %c34_56] : memref<6x256xf32, #tpu.memory_space<vmem>>, vector<3x222xf32>
    %c24_57 = arith.constant 24 : index
    %c256_58 = arith.constant 256 : index
    %39 = vector.load %arg4[%c24_57, %c256_58] : memref<32x512xf32, #tpu.memory_space<vmem>>, vector<3x222xf32>
    tpu.vector_store %arg4[%c24_57, %c256_58], %38 {strides = array<i32>} : memref<32x512xf32, #tpu.memory_space<vmem>>, vector<3x222xf32>,
    %c0_59 = arith.constant 0 : index
    %c0_60 = arith.constant 0 : index
    %40 = vector.load %arg2[%c0_59, %c0_60] : memref<8x32xf32, #tpu.memory_space<vmem>>, vector<8x32xf32>
    %c0_61 = arith.constant 0 : index
    %c0_62 = arith.constant 0 : index
    %41 = vector.load %arg4[%c0_61, %c0_62] : memref<32x512xf32, #tpu.memory_space<vmem>>, vector<32x512xf32>
    %cst_63 = arith.constant dense<0.000000e+00> : vector<8x512xf32>
    %42 = tpu.matmul %40, %41, %cst_63 {dimension_numbers = #tpu.dot_dimension_numbers<[1], [0], [0], [1], [0, 0, 1, 1], [], []>} : vector<8x32xf32>, vector<32x512xf32>, vector<8x512xf32> -> vector<8x512xf32>
    %43 = vector.extract_strided_slice %42 {offsets = [0, 0], sizes = [8, 256], strides = [1, 1]} : vector<8x512xf32> to vector<8x256xf32>
    %c0_64 = arith.constant 0 : index
    %c0_65 = arith.constant 0 : index
    %c0_66 = arith.constant 0 : index
    %44 = vector.load %arg3[%c0_64, %c0_65, %c0_66] : memref<2x8x256xf32, #tpu.memory_space<vmem>>, vector<1x8x256xf32>
    %45 = vector.shape_cast %44 : vector<1x8x256xf32> to vector<8x256xf32>
    %46 = vector.shape_cast %43 : vector<8x256xf32> to vector<1x8x256xf32>
    tpu.vector_store %arg3[%c0_64, %c0_65, %c0_66], %46 {strides = array<i32>} : memref<2x8x256xf32, #tpu.memory_space<vmem>>, vector<1x8x256xf32>,
    %47 = vector.extract_strided_slice %42 {offsets = [0, 256], sizes = [8, 256], strides = [1, 1]} : vector<8x512xf32> to vector<8x256xf32>
    %c1_67 = arith.constant 1 : index
    %c0_68 = arith.constant 0 : index
    %c0_69 = arith.constant 0 : index
    %48 = vector.load %arg3[%c1_67, %c0_68, %c0_69] : memref<2x8x256xf32, #tpu.memory_space<vmem>>, vector<1x8x256xf32>
    %49 = vector.shape_cast %48 : vector<1x8x256xf32> to vector<8x256xf32>
    %50 = vector.shape_cast %47 : vector<8x256xf32> to vector<1x8x256xf32>
    tpu.vector_store %arg3[%c1_67, %c0_68, %c0_69], %50 {strides = array<i32>} : memref<2x8x256xf32, #tpu.memory_space<vmem>>, vector<1x8x256xf32>,
    return
  }
  func.func @transform_0(%arg0: i32) -> (i32, i32) {
    %c0_i32 = arith.constant 0 : i32
    %c0_i32_0 = arith.constant 0 : i32
    %c0_i32_1 = arith.constant 0 : i32
    return %c0_i32, %c0_i32_0 : i32, i32
  }
  func.func @transform_1(%arg0: i32) -> (i32, i32) {
    %c0_i32 = arith.constant 0 : i32
    %c0_i32_0 = arith.constant 0 : i32
    %c0_i32_1 = arith.constant 0 : i32
    return %c0_i32, %c0_i32_0 : i32, i32
  }
  func.func @transform_2(%arg0: i32) -> (i32, i32, i32) {
    %c0_i32 = arith.constant 0 : i32
    %c0_i32_0 = arith.constant 0 : i32
    %c0_i32_1 = arith.constant 0 : i32
    %c0_i32_2 = arith.constant 0 : i32
    return %c0_i32, %c0_i32_0, %c0_i32_1 : i32, i32, i32
  }
}

</mosaic_0001>

<bundles_post_ra>
// kernel: tpu_custom_call.1
= control target key start
LH: loop header
LB: loop body
LE: loop exit
PB: predicated region body
PF: predicated region fallthrough
CT: control target
= control target key end

     0   :  { %7 = vsyncpa [#allocation4], 0  ;;  %s675_s0 = inlined_call_operand.hbm [shape: f32[6,256], index: 0, kind: input, shape index: {}]   ;;  %s676_s1 = inlined_call_operand.hbm [shape: f32[8,32], index: 1, kind: input, shape index: {}]   ;;  %s677_s2 = inlined_call_operand.hbm [shape: f32[2,8,256], index: 2, kind: output, shape index: {}]  }
   0x1   :  { %8 = vsyncpa [#allocation7], 0 }
   0x2   :  { %9 = vsyncpa [#allocation5], 0  ;;  %s15_s11 = sshll.u32 %s675_s0, 4  ;;  %s562_s12 = smov [#allocation3]   ;;  %s16_s11 = int_to_ptr.hbm [resolvable:$true] %s15_s11 }
   0x3   :  { %s17_s13 = sshll.u32 %s562_s12, 4  ;;  %s26_s16 = sshll.u32 %s676_s1, 4  ;;  %s18_s13 = int_to_ptr.vmem [resolvable:$true] %s17_s13  ;;  %s27_s16 = int_to_ptr.hbm [resolvable:$true] %s26_s16 }
   0x4   :  { %20 = dma.hbm_to_vmem [thread:$0]  %s16_s11, 256, %s18_s13, [#allocation4]  }
   0x5   :  { %s563_s17 = smov [#allocation6]  }
   0x6   :  { %s28_s18 = sshll.u32 %s563_s17, 4  ;;  %s29_s18 = int_to_ptr.vmem [resolvable:$true] %s28_s18 }
   0x7   :  { %31 = dma.hbm_to_vmem [thread:$0]  %s27_s16, 128, %s29_s18, [#allocation7]  }
   0x8   :  { %556 = dma.done.wait [#allocation4], 256  }
   0x9   :  { %557 = vsyncadd [#allocation4], 4294967040 }
   0xa   :  { %558 = dma.done.wait [#allocation7], 128  }
   0xb   :  { %559 = vsyncadd [#allocation7], 4294967168  ;;  %v324_v0 = vld [vmem:[#allocation3] sm:$0x38]  ;;  %s564_s0 = smov 94   ;;  %s565_s1 = smov 110   ;;  %v56_v61 = vlaneseq }
   0xc   :  { %v277_v1 = vld [vmem:[#allocation3] sm:$0x38]  ;;  %v328_v2 = vrot.slane %v324_v0, 3  ;;  %v325_v6 = vld [vmem:[#allocation3 + $0x8] sm:$0x38]  ;;  %s566_s19 = smov 96  }
   0xd   :  { %v281_v3 = vrot.slane %v277_v1, 4  ;;  %v294_v4 = vld [vmem:[#allocation3] sm:$0x38]  ;;  %v278_v7 = vld [vmem:[#allocation3 + $0x8] sm:$0x38]  ;;  %v329_v9 = vrot.slane %v325_v6, 3 }
   0xe   :  { %v298_v5 = vrot.slane %v294_v4, 1  ;;  %330 = vrot.lane.b32.xlu0 %v328_v2, %s564_s0  ;;  %v295_v8 = vld [vmem:[#allocation3 + $0x8] sm:$0x38]  ;;  %v282_v10 = vrot.slane %v278_v7, 4  ;;  %v309_v12 = vld [vmem:[#allocation3] sm:$0x38] }
   0xf   :  { %283 = vrot.lane.b32.xlu1 %v281_v3, %s565_s1  ;;  %v299_v11 = vrot.slane %v295_v8, 1  ;;  %v310_v13 = vld [vmem:[#allocation3 + $0x8] sm:$0x38]  ;;  %v230_v14 = vld [vmem:[#allocation3] sm:$0x38]  ;;  %v313_v15 = vrot.slane %v309_v12, 6 }
  0x10   :  { %300 = vrot.lane.b32.xlu2 %v298_v5, %s566_s19  ;;  %v314_v16 = vrot.slane %v310_v13, 6  ;;  %v234_v17 = vrot.slane %v230_v14, 5  ;;  %s567_s20 = smov 95   ;;  %v247_v18 = vld [vmem:[#allocation3] sm:$0x38]  ;;  %s568_s21 = smov 126  }
  0x11   :  { %v231_v19 = vld [vmem:[#allocation3 + $0x8] sm:$0x38]  ;;  %v251_v21 = vrot.slane %v247_v18, 2  ;;  %s569_s22 = smov 112   ;;  %v262_v25 = vld [vmem:[#allocation3] sm:$0x38] }
  0x12   :  { %v248_v20 = vld [vmem:[#allocation3 + $0x8] sm:$0x38]  ;;  %v235_v22 = vrot.slane %v231_v19, 5  ;;  %v266_v27 = vrot.slane %v262_v25, 7  ;;  %v193_v28 = vld [vmem:[#allocation3] sm:$0x7] }
  0x13   :  { %v252_v23 = vrot.slane %v248_v20, 2  ;;  %v263_v24 = vld [vmem:[#allocation3 + $0x8] sm:$0x38]  ;;  %s570_s23 = smov 111   ;;  %v217_v29 = vld [vmem:[#allocation3] sm:$0x38] }
  0x14   :  { %v267_v26 = vrot.slane %v263_v24, 7  ;;  %v194_v30 = vld [vmem:[#allocation3 + $0x8] sm:$0x7]  ;;  %v218_v31 = vld [vmem:[#allocation3 + $0x8] sm:$0x38]  ;;  %s571_s24 = smov 127  }
  0x15   :  { %v140_v32 = vld [vmem:[#allocation3 + $0x8] sm:$0x7]  ;;  %v139_v33 = vld [vmem:[#allocation3] sm:$0x7]  ;;  %v572_v49 = vmov 0.0   ;;  %vm58_vm0 = vcmp.lt.s32.totalorder %v56_v61, 512 }
  0x16   :  { %332 = vrot.lane.b32.xlu0 %v329_v9, %s564_s0  ;;  %v159_v34 = vld [vmem:[#allocation3] sm:$0x7]  ;;  %v144_v35 = vrot.slane %v140_v32, 1  ;;  %v143_v36 = vrot.slane %v139_v33, 1  ;;  %v160_v39 = vld [vmem:[#allocation3 + $0x8] sm:$0x7] }
  0x17   :  { %285 = vrot.lane.b32.xlu1 %v282_v10, %s565_s1  ;;  %v163_v37 = vrot.slane %v159_v34, 6  ;;  %v176_v38 = vld [vmem:[#allocation3] sm:$0x7]  ;;  %v177_v40 = vld [vmem:[#allocation3 + $0x8] sm:$0x7]  ;;  %v164_v42 = vrot.slane %v160_v39, 6 }
  0x18   :  { %302 = vrot.lane.b32.xlu2 %v299_v11, %s566_s19  ;;  %v180_v41 = vrot.slane %v176_v38, 3  ;;  %v181_v43 = vrot.slane %v177_v40, 3  ;;  %v86_v44 = vld [vmem:[#allocation3 + $0x8] sm:$0x7]  ;;  %v85_v45 = vld [vmem:[#allocation3] sm:$0x7] }
  0x19   :  { %v105_v46 = vld [vmem:[#allocation3] sm:$0x7]  ;;  %v90_v47 = vrot.slane %v86_v44, 2  ;;  %v89_v48 = vrot.slane %v85_v45, 2  ;;  %50 = vst [vmem:[#allocation2 + $0x50] sm:$0xff] %v572_v49  ;;  %v573_v62 = vmov 1.0  }
  0x1a   :  { %v109_v50 = vrot.slane %v105_v46, 7  ;;  %51 = vst [vmem:[#allocation2 + $0x58] sm:$0xff] %v572_v49  ;;  %v122_v51 = vld [vmem:[#allocation3] sm:$0x7]  ;;  %v106_v52 = vld [vmem:[#allocation3 + $0x8] sm:$0x7] }
  0x1b   :  { %40 = vst [vmem:[#allocation2] sm:$0xff] %v572_v49  ;;  %v123_v53 = vld [vmem:[#allocation3 + $0x8] sm:$0x7]  ;;  %v126_v54 = vrot.slane %v122_v51, 4  ;;  %v110_v55 = vrot.slane %v106_v52, 7  ;;  %vm169_vm1 = vcmask 785408  }
  0x1c   :  { %41 = vst [vmem:[#allocation2 + $0x8] sm:$0xff] %v572_v49  ;;  %v127_v56 = vrot.slane %v123_v53, 4  ;;  %v69_v57 = vld [vmem:[#allocation3 + $0x8] sm:$0x7]  ;;  %v68_v58 = vld [vmem:[#allocation3] sm:$0x7] }
  0x1d   :  { %42 = vst [vmem:[#allocation2 + $0x10] sm:$0xff] %v572_v49  ;;  %v73_v59 = vrot.slane %v69_v57, 5  ;;  %v72_v60 = vrot.slane %v68_v58, 5  ;;  %vm174_vm2 = vcmask 765954   ;;  %v207_v3 = vld [vmem:[#allocation3] sm:$0x38] }
  0x1e   :  { %315 = vrot.lane.b32.xlu0 %v313_v15, %s567_s20  ;;  %43 = vst [vmem:[#allocation2 + $0x18] sm:$0xff] %v572_v49  ;;  %v208_v4 = vld [vmem:[#allocation3 + $0x8] sm:$0x38]  ;;  %v211_v5 = vrot.slane %v207_v3, 3  ;;  %vm66_vm3 = vcmask 763904   ;;  %vm679_vm4 = vcmask 764929  }
  0x1f   :  { %317 = vrot.lane.b32.xlu1 %v314_v16, %s567_s20  ;;  %44 = vst [vmem:[#allocation2 + $0x20] sm:$0xff] %v572_v49  ;;  %v212_v6 = vrot.slane %v208_v4, 3  ;;  %vm201_vm5 = vcmask 769024   ;;  %vm149_vm6 = vcmask 900096   ;;  %vm154_vm7 = vcmask 769031   ;;  %s574_s25 = smov [#allocation8]  }
  0x20   :  { %236 = vrot.lane.b32.xlu2 %v234_v17, %s568_s21  ;;  %45 = vst [vmem:[#allocation2 + $0x28] sm:$0xff] %v572_v49  ;;  %vm157_vm8 = vcmask 762880   ;;  %vm186_vm9 = vcmask 777216   ;;  %vm191_vm10 = vcmask 769029   ;;  %vm678_vm11 = vcmask 766979   ;;  %s449_s26 = sshll.u32 %s574_s25, 4  ;;  %s450_s26 = int_to_ptr.vmem [resolvable:$true] %s449_s26 }
  0x21   :  { %46 = vst [vmem:[#allocation2 + $0x30] sm:$0xff] %v572_v49  ;;  %vm115_vm12 = vcmask 916480   ;;  %vm95_vm13 = vcmask 1031168   ;;  %vm100_vm14 = vcmask 769030   ;;  %vm103_vm15 = vcmask 761856   ;;  %s451_s29 = sshll.u32 %s677_s2, 4  ;;  %s452_s29 = int_to_ptr.hbm [resolvable:$true] %s451_s29 }
  0x22   :  { %47 = vst [vmem:[#allocation2 + $0x38] sm:$0xff] %v572_v49  ;;  %v64_v32 = vld [vmem:[#allocation3 + $0x8] sm:$0x7]  ;;  %v63_v33 = vld [vmem:[#allocation3] sm:$0x7]  ;;  %s575_s30 = smov 256  }
  0x23   :  { %48 = vst [vmem:[#allocation2 + $0x40] sm:$0xff] %v572_v49  ;;  %s576_s3 = smov 16  }
  0x24   :  { %49 = vst [vmem:[#allocation2 + $0x48] sm:$0xff] %v572_v49 }
  0x25   :  { %52 = vst [vmem:[#allocation2 + $0x60] sm:$0xff] %v572_v49 }
  0x26   :  { %238 = vrot.lane.b32.xlu0 %v235_v22, %s568_s21  ;;  %53 = vst [vmem:[#allocation2 + $0x68] sm:$0xff] %v572_v49 }
  0x27   :  { %253 = vrot.lane.b32.xlu1 %v251_v21, %s569_s22  ;;  %54 = vst [vmem:[#allocation2 + $0x70] sm:$0xff] %v572_v49 }
  0x28   :  { %255 = vrot.lane.b32.xlu2 %v252_v23, %s569_s22  ;;  %55 = vst [vmem:[#allocation2 + $0x78] sm:$0xff] %v572_v49  ;;  %v339_v49 = vld [vmem:[#allocation6] sm:$0xff] }
  0x29   :  { %61 = vst.msk [vmem:[#allocation2 + $0x63] ss:$8 sm:$0xf] %vm58_vm0, %v573_v62  ;;  %vm137_vm0 = vcmask 768004  }
  0x2a   :  { %215 = vst [vmem:[#allocation2 + $0x10] sm:$0x7] %v211_v5 }
  0x2b   :  { %216 = vst.msk [vmem:[#allocation2 + $0x18] sm:$0x7] %vm66_vm3, %v212_v6 }
  0x2c   :  { %67 = vst.msk [vmem:[#allocation2 + $0x8] sm:$0x7] %vm66_vm3, %v64_v32 }
  0x2d   :  { %65 = vst [vmem:[#allocation2] sm:$0x7] %v63_v33 }
  0x2e   :  { %268 = vrot.lane.b32.xlu0 %v266_v27, %s570_s23 }
  0x2f   :  { %270 = vrot.lane.b32.xlu1 %v267_v26, %s570_s23 }
  0x30   :  { %197 = vrot.lane.b32.xlu2 %v193_v28, %s564_s0 }
  0x36   :  { %199 = vrot.lane.b32.xlu0 %v194_v30, %s564_s0 }
  0x37   :  { %221 = vrot.lane.b32.xlu1 %v217_v29, %s571_s24 }
  0x38   :  { %223 = vrot.lane.b32.xlu2 %v218_v31, %s571_s24 }
  0x3e   :  { %145 = vrot.lane.b32.xlu0 %v143_v36, %s565_s1 }
  0x3f   :  { %147 = vrot.lane.b32.xlu1 %v144_v35, %s565_s1 }
  0x40   :  { %165 = vrot.lane.b32.xlu2 %v163_v37, %s566_s19 }
  0x46   :  { %167 = vrot.lane.b32.xlu0 %v164_v42, %s566_s19 }
  0x47   :  { %182 = vrot.lane.b32.xlu1 %v180_v41, %s567_s20 }
  0x48   :  { %184 = vrot.lane.b32.xlu2 %v181_v43, %s567_s20 }
  0x4e   :  { %91 = vrot.lane.b32.xlu0 %v89_v48, %s568_s21 }
  0x4f   :  { %93 = vrot.lane.b32.xlu1 %v90_v47, %s568_s21 }
  0x50   :  { %111 = vrot.lane.b32.xlu2 %v109_v50, %s569_s22 }
  0x56   :  { %113 = vrot.lane.b32.xlu0 %v110_v55, %s569_s22 }
  0x57   :  { %128 = vrot.lane.b32.xlu1 %v126_v54, %s570_s23 }
  0x58   :  { %130 = vrot.lane.b32.xlu2 %v127_v56, %s570_s23 }
  0x5e   :  { %74 = vrot.lane.b32.xlu0 %v72_v60, %s571_s24 }
  0x5f   :  { %76 = vrot.lane.b32.xlu1 %v73_v59, %s571_s24 }
  0x6a   :  { %v301_v63 = vpop.permute.xlu2 %300 }
  0x72   :  { %v303_v0 = vpop.permute.xlu2 %302 }
  0x73   :  { %v304_v1 = vsel %vm169_vm1, %v301_v63, %v303_v0  ;;  %308 = vst.msk [vmem:[#allocation2 + $0x58] sm:$0x1c] %vm174_vm2, %v303_v0 }
  0x74   :  { %307 = vst [vmem:[#allocation2 + $0x50] sm:$0x1c] %v304_v1 }
  0x7a   :  { %v237_v2 = vpop.permute.xlu2 %236 }
  0x80   :  { %v331_v7 = vpop.permute.xlu0 %330 }
  0x81   :  { %v284_v8 = vpop.permute.xlu1 %283 }
  0x82   :  { %v256_v9 = vpop.permute.xlu2 %255 }
  0x83   :  { %261 = vst.msk [vmem:[#allocation2 + $0x38] sm:$0xe] %vm679_vm4, %v256_v9  ;;  %vm78_vm4 = vcmask 1039360  }
  0x88   :  { %v333_v10 = vpop.permute.xlu0 %332 }
  0x89   :  { %v286_v11 = vpop.permute.xlu1 %285  ;;  %v334_v12 = vsel %vm201_vm5, %v331_v7, %v333_v10  ;;  %338 = vst.msk [vmem:[#allocation2 + $0x78] sm:$0x7] %vm66_vm3, %v333_v10 }
  0x8a   :  { %v287_v13 = vsel %vm149_vm6, %v284_v8, %v286_v11  ;;  %v198_v14 = vpop.permute.xlu2 %197  ;;  %337 = vst [vmem:[#allocation2 + $0x70] sm:$0x7] %v334_v12 }
  0x8b   :  { %290 = vst [vmem:[#allocation2 + $0x30] sm:$0x80] %v287_v13 }
  0x8c   :  { %291 = vst.msk [vmem:[#allocation2 + $0x38] sm:$0x80] %vm154_vm7, %v286_v11 }
  0x8d   :  { %292 = vst [vmem:[#allocation2 + $0x50] sm:$0x3] %v287_v13 }
  0x8e   :  { %293 = vst.msk [vmem:[#allocation2 + $0x58] sm:$0x3] %vm157_vm8, %v286_v11 }
  0x90   :  { %v316_v15 = vpop.permute.xlu0 %315  ;;  %v355_v17 = vld [vmem:[#allocation2 + $0x78] sm:$0xff] }
  0x91   :  { %v318_v16 = vpop.permute.xlu1 %317  ;;  %432 = vmatpush.msra.mxu3 %v355_v17  ;;  %v354_v19 = vld [vmem:[#allocation2 + $0x70] sm:$0xff] }
  0x92   :  { %v319_v18 = vsel %vm186_vm9, %v316_v15, %v318_v16  ;;  %323 = vst.msk [vmem:[#allocation2 + $0x58] sm:$0xe0] %vm191_vm10, %v318_v16  ;;  %v224_v20 = vpop.permute.xlu2 %223  ;;  %412 = vmatpush.msra.mxu2 %v354_v19 }
  0x93   :  { %322 = vst [vmem:[#allocation2 + $0x50] sm:$0xe0] %v319_v18 }
  0x94   :  { %229 = vst.msk [vmem:[#allocation2 + $0x18] sm:$0x38] %vm678_vm11, %v224_v20  ;;  %vm132_vm11 = vcmask 908288  }
  0x98   :  { %v239_v22 = vpop.permute.xlu0 %238 }
  0x99   :  { %v254_v21 = vpop.permute.xlu1 %253  ;;  %v351_v23 = vld [vmem:[#allocation2 + $0x58] sm:$0xff]  ;;  %v240_v25 = vsel %vm95_vm13, %v237_v2, %v239_v22  ;;  %244 = vst.msk [vmem:[#allocation2 + $0x18] sm:$0xc0] %vm100_vm14, %v239_v22 }
  0x9a   :  { %v257_v24 = vsel %vm115_vm12, %v254_v21, %v256_v9  ;;  %433 = vmatpush.msra.mxu3 %v351_v23  ;;  %v350_v26 = vld [vmem:[#allocation2 + $0x50] sm:$0xff]  ;;  %v166_v27 = vpop.permute.xlu2 %165  ;;  %243 = vst [vmem:[#allocation2 + $0x10] sm:$0xc0] %v240_v25 }
  0x9b   :  { %260 = vst [vmem:[#allocation2 + $0x30] sm:$0xe] %v257_v24  ;;  %413 = vmatpush.msra.mxu2 %v350_v26 }
  0x9c   :  { %245 = vst [vmem:[#allocation2 + $0x30] sm:$0x1] %v240_v25 }
  0x9d   :  { %246 = vst.msk [vmem:[#allocation2 + $0x38] sm:$0x1] %vm103_vm15, %v239_v22 }
  0xa0   :  { %v269_v29 = vpop.permute.xlu0 %268  ;;  %v343_v41 = vld [vmem:[#allocation2 + $0x18] sm:$0xff] }
  0xa1   :  { %v271_v28 = vpop.permute.xlu1 %270 }
  0xa2   :  { %276 = vst.msk [vmem:[#allocation2 + $0x38] sm:$0x70] %vm137_vm0, %v271_v28  ;;  %v272_v30 = vsel %vm132_vm11, %v269_v29, %v271_v28  ;;  %v185_v31 = vpop.permute.xlu2 %184 }
  0xa3   :  { %275 = vst [vmem:[#allocation2 + $0x30] sm:$0x70] %v272_v30 }
  0xa4   :  { %192 = vst.msk [vmem:[#allocation2 + $0x48] sm:$0xe0] %vm191_vm10, %v185_v31 }
  0xa8   :  { %v200_v35 = vpop.permute.xlu0 %199 }
  0xa9   :  { %v222_v34 = vpop.permute.xlu1 %221  ;;  %v347_v36 = vld [vmem:[#allocation2 + $0x38] sm:$0xff]  ;;  %v202_v38 = vsel %vm201_vm5, %v198_v14, %v200_v35  ;;  %206 = vst.msk [vmem:[#allocation2 + $0x68] sm:$0x7] %vm66_vm3, %v200_v35  ;;  %vm356_vm3 = vcmask 261120  }
  0xaa   :  { %v225_v37 = vsel %vm78_vm4, %v222_v34, %v224_v20  ;;  %434 = vmatpush.msra.mxu3 %v347_v36  ;;  %v346_v39 = vld [vmem:[#allocation2 + $0x30] sm:$0xff]  ;;  %v112_v40 = vpop.permute.xlu2 %111  ;;  %205 = vst [vmem:[#allocation2 + $0x60] sm:$0x7] %v202_v38 }
  0xab   :  { %228 = vst [vmem:[#allocation2 + $0x10] sm:$0x38] %v225_v37  ;;  %414 = vmatpush.msra.mxu2 %v346_v39 }
  0xac   :  { %435 = vmatpush.msra.mxu3 %v343_v41 }
  0xad   :  { %468 = vmatmul.msk.f32.vlgmr.msra.gmra.mxu3 %vm356_vm3, %v339_v49 }
  0xb0   :  { %v146_v43 = vpop.permute.xlu0 %145  ;;  %v353_v44 = vld [vmem:[#allocation2 + $0x68] sm:$0xff] }
  0xb1   :  { %v148_v42 = vpop.permute.xlu1 %147  ;;  %392 = vmatpush.msra.mxu1 %v353_v44  ;;  %v352_v47 = vld [vmem:[#allocation2 + $0x60] sm:$0xff] }
  0xb2   :  { %155 = vst.msk [vmem:[#allocation2 + $0x28] sm:$0x80] %vm154_vm7, %v148_v42  ;;  %v150_v45 = vsel %vm149_vm6, %v146_v43, %v148_v42  ;;  %v342_v46 = vld [vmem:[#allocation2 + $0x10] sm:$0xff]  ;;  %v131_v48 = vpop.permute.xlu2 %130  ;;  %372 = vmatpush.msra.mxu0 %v352_v47 }
  0xb3   :  { %158 = vst.msk [vmem:[#allocation2 + $0x48] sm:$0x3] %vm157_vm8, %v148_v42  ;;  %415 = vmatpush.msra.mxu2 %v342_v46 }
  0xb4   :  { %153 = vst [vmem:[#allocation2 + $0x20] sm:$0x80] %v150_v45  ;;  %467 = vmatmul.msk.f32.vlgmr.msra.gmra.mxu2 %vm356_vm3, %v339_v49 }
  0xb5   :  { %156 = vst [vmem:[#allocation2 + $0x40] sm:$0x3] %v150_v45 }
  0xb6   :  { %138 = vst.msk [vmem:[#allocation2 + $0x28] sm:$0x70] %vm137_vm0, %v131_v48 }
  0xb8   :  { %v168_v51 = vpop.permute.xlu0 %167 }
  0xb9   :  { %v183_v50 = vpop.permute.xlu1 %182  ;;  %v170_v53 = vsel %vm169_vm1, %v166_v27, %v168_v51  ;;  %175 = vst.msk [vmem:[#allocation2 + $0x48] sm:$0x1c] %vm174_vm2, %v168_v51  ;;  %vm680_vm1 = vcmask 764929   ;;  %vm681_vm2 = vcmask 766979  }
  0xba   :  { %v187_v52 = vsel %vm186_vm9, %v183_v50, %v185_v31  ;;  %173 = vst [vmem:[#allocation2 + $0x40] sm:$0x1c] %v170_v53 }
  0xbb   :  { %190 = vst [vmem:[#allocation2 + $0x40] sm:$0xe0] %v187_v52 }
  0xc0   :  { %v92_v55 = vpop.permute.xlu0 %91  ;;  %v349_v56 = vld [vmem:[#allocation2 + $0x48] sm:$0xff] }
  0xc1   :  { %v94_v54 = vpop.permute.xlu1 %93  ;;  %393 = vmatpush.msra.mxu1 %v349_v56 }
  0xc2   :  { %101 = vst.msk [vmem:[#allocation2 + $0x8] sm:$0xc0] %vm100_vm14, %v94_v54  ;;  %v96_v57 = vsel %vm95_vm13, %v92_v55, %v94_v54  ;;  %v348_v58 = vld [vmem:[#allocation2 + $0x40] sm:$0xff] }
  0xc3   :  { %104 = vst.msk [vmem:[#allocation2 + $0x28] sm:$0x1] %vm103_vm15, %v94_v54  ;;  %373 = vmatpush.msra.mxu0 %v348_v58 }
  0xc4   :  { %99 = vst [vmem:[#allocation2] sm:$0xc0] %v96_v57 }
  0xc5   :  { %102 = vst [vmem:[#allocation2 + $0x20] sm:$0x1] %v96_v57 }
  0xc8   :  { %v114_v60 = vpop.permute.xlu0 %113 }
  0xc9   :  { %v129_v59 = vpop.permute.xlu1 %128  ;;  %v116_v62 = vsel %vm115_vm12, %v112_v40, %v114_v60  ;;  %121 = vst.msk [vmem:[#allocation2 + $0x28] sm:$0xe] %vm680_vm1, %v114_v60 }
  0xca   :  { %v133_v61 = vsel %vm132_vm11, %v129_v59, %v131_v48  ;;  %119 = vst [vmem:[#allocation2 + $0x20] sm:$0xe] %v116_v62 }
  0xcb   :  { %136 = vst [vmem:[#allocation2 + $0x20] sm:$0x70] %v133_v61 }
  0xd0   :  { %v75_v0 = vpop.permute.xlu0 %74  ;;  %v345_v1 = vld [vmem:[#allocation2 + $0x28] sm:$0xff] }
  0xd1   :  { %v77_v63 = vpop.permute.xlu1 %76  ;;  %394 = vmatpush.msra.mxu1 %v345_v1 }
  0xd2   :  { %84 = vst.msk [vmem:[#allocation2 + $0x8] sm:$0x38] %vm681_vm2, %v77_v63  ;;  %v79_v2 = vsel %vm78_vm4, %v75_v0, %v77_v63  ;;  %v344_v3 = vld [vmem:[#allocation2 + $0x20] sm:$0xff] }
  0xd3   :  { %82 = vst [vmem:[#allocation2] sm:$0x38] %v79_v2  ;;  %374 = vmatpush.msra.mxu0 %v344_v3 }
  0xd9   :  { %v341_v4 = vld [vmem:[#allocation2 + $0x8] sm:$0xff] }
  0xda   :  { %395 = vmatpush.msra.mxu1 %v341_v4  ;;  %v340_v5 = vld [vmem:[#allocation2] sm:$0xff] }
  0xdb   :  { %375 = vmatpush.msra.mxu0 %v340_v5  ;;  %466 = vmatmul.msk.f32.vlgmr.msra.gmra.mxu1 %vm356_vm3, %v339_v49 }
  0xdc   :  { %465 = vmatmul.msk.f32.vlgmr.msra.gmra.mxu0 %vm356_vm3, %v339_v49 }
 0x130   :  { %v437_v7 = vpop.f32.mrf.mxu3 }
 0x131   :  { %444 = vst [vmem:[#allocation8 + $0x18] sm:$0xff] %v437_v7 }
 0x137   :  { %v417_v6 = vpop.f32.mrf.mxu2 }
 0x138   :  { %443 = vst [vmem:[#allocation8 + $0x10] sm:$0xff] %v417_v6 }
 0x158   :  { %v397_v8 = vpop.f32.mrf.mxu1 }
 0x159   :  { %v377_v9 = vpop.f32.mrf.mxu0  ;;  %441 = vst [vmem:[#allocation8 + $0x8] sm:$0xff] %v397_v8 }
 0x15a   :  { %440 = vst [vmem:[#allocation8] sm:$0xff] %v377_v9 }
 0x15b   :  { %457 = dma.vmem_to_hbm [thread:$0]  %s450_s26, 512, %s452_s29, [#allocation5], %s575_s30, %s575_s30, %s576_s3  }
 0x15c   :  { %560 = dma.done.wait [#allocation5], 512  }
 0x15d   :  { %561 = vsyncadd [#allocation5], 4294966784 }
 0x15e   :  { %462 = vsyncpa [#allocation4], 1 }
 0x15f   :  { %463 = vsyncpa [#allocation7], 1 }
 0x160   :  { %464 = vsyncpa [#allocation5], 1 }

</bundles_post_ra>
